<compile_context>
chip_gen: v7x
topology: tpu7x:2x2x1
jax: 0.10.0
libtpu: 0.0.40
codegen_flags: <defaults>
</compile_context>

<pallas_src>
import functools
import math

import numpy as np
import jax
import jax.numpy as jnp
from jax.experimental import pallas as pl
from jax.experimental.pallas import tpu as pltpu


# ----------------------------------------------------------------------------
# Bicubic interpolation matrices (matches torch interpolate mode='bicubic',
# align_corners=False, a=-0.75, with boundary index clamping). Cached.
# ----------------------------------------------------------------------------
def _cubic_kernel(x, a=-0.75):
    x = abs(x)
    if x <= 1.0:
        return (a + 2.0) * x**3 - (a + 3.0) * x**2 + 1.0
    if x < 2.0:
        return a * x**3 - 5.0 * a * x**2 + 8.0 * a * x - 4.0 * a
    return 0.0


@functools.lru_cache(maxsize=None)
def bicubic_matrix(in_size, out_size):
    """M (out, in) such that  out_vec = M @ in_vec  reproduces torch bicubic."""
    scale = in_size / out_size
    m = np.zeros((out_size, in_size), dtype=np.float32)
    for i in range(out_size):
        src = (i + 0.5) * scale - 0.5
        x0 = math.floor(src)
        t = src - x0
        for k in range(-1, 3):
            w = _cubic_kernel(k - t)
            idx = min(max(x0 + k, 0), in_size - 1)
            m[i, idx] += w
    return m


@functools.lru_cache(maxsize=None)
def _head_constants(h, w, ho, wo):
    """Per-(H, W, Ho, Wo) constants for one head.

    Returns:
      srcmask: (9, lf + 2*(w+1)) 0/1 mask on the zero-extended flat tap maps
               (zeroes contributions whose conv source pixel is out of image).
      mrow   : (h, lf) row-selection mask, Mrow[h, j] = [j // w == h].
      qr     : (lf, wo) flat column-resize matrix, QR[j, p] = R[p, j % w].
      lmat   : bicubic row matrix, (2, ho//2, h) if even/odd packed else (1, ho, h).
      pack   : whether even/odd packing is used (store becomes 128-lane dense).
    """
    lf = h * w
    wp = w + 1
    extw = lf + 2 * wp
    L = bicubic_matrix(h, ho)          # (ho, h)
    R = bicubic_matrix(w, wo)          # (wo, w)

    rows = np.arange(lf) // w
    cols = np.arange(lf) % w

    srcmask = np.zeros((9, extw), np.float32)
    for dy in range(3):
        for dx in range(3):
            k = 3 * dy + dx
            d = (dy - 1) * w + (dx - 1)
            ok = ((rows + dy - 1 >= 0) & (rows + dy - 1 < h) &
                  (cols + dx - 1 >= 0) & (cols + dx - 1 < w))
            srcmask[k, wp + d + np.arange(lf)] = ok.astype(np.float32)

    mrow = np.zeros((h, lf), np.float32)
    mrow[rows, np.arange(lf)] = 1.0

    qr = np.ascontiguousarray(R.T[cols, :]).astype(np.float32)      # (lf, wo)

    pack = (wo % 128 != 0) and ((2 * wo) % 128 == 0) and (ho % 2 == 0)
    if pack:
        lmat = np.stack([L[0::2], L[1::2]], axis=0).astype(np.float32)  # (2, ho//2, h)
    else:
        lmat = L[None].astype(np.float32)                               # (1, ho, h)

    return (jnp.asarray(srcmask), jnp.asarray(mrow), jnp.asarray(qr),
            jnp.asarray(lmat), pack)


# ----------------------------------------------------------------------------
# Pallas kernel: per-batch  conv3x3(C->1) + bias + sigmoid + bicubic resize
# ----------------------------------------------------------------------------
def aux_head_kernel(x_ref, w_ref, b_ref, sm_ref, mrow_ref, qr_ref, l_ref,
                    o_ref, *, H, W, pack):
    # x_ref   : (C, H*W)         one batch element, NCHW with flat spatial (lanes)
    # w_ref   : (9, C)           conv taps, row k = 3*dy + dx
    # b_ref   : (1,)             bias (SMEM)
    # sm_ref  : (9, lf + 2*wp)   0/1 source-validity mask on the extended taps
    # mrow_ref: (H, lf)          row-selection mask (matmul-based unflatten)
    # qr_ref  : (lf, Wo)         flat column-resize matrix
    # l_ref   : (2, Ho//2, H) or (1, Ho, H)  bicubic row matrix (maybe packed)
    # o_ref   : (Ho//2, 2*Wo) if packed else (Ho, Wo)
    lf = H * W
    wp = W + 1   # zero extension so every shifted slice stays in bounds

    # (1) Channel contraction for all 9 taps: one bf16 MXU matmul, f32 accum.
    taps = jnp.dot(w_ref[...].astype(jnp.bfloat16),
                   x_ref[...].astype(jnp.bfloat16),
                   preferred_element_type=jnp.float32)           # (9, lf)

    # (2) Zero-extend along flat-spatial and mask out-of-image source
    #     positions with ONE sublane-dense multiply.
    zpad = jnp.zeros((9, wp), jnp.float32)
    ext = jnp.concatenate([zpad, taps, zpad], axis=1) * sm_ref[...]  # (9, lf+2wp)

    # (3) 3x3 spatial accumulation: sum of 9 statically shifted lane slices
    #     (masking already applied above, so these are pure adds).
    acc = None
    for dy in range(3):
        for dx in range(3):
            k = 3 * dy + dx
            d = (dy - 1) * W + (dx - 1)
            s = ext[k:k + 1, wp + d:wp + d + lf]                 # (1, lf)
            acc = s if acc is None else acc + s

    y = jax.nn.sigmoid(acc + b_ref[0])                           # (1, lf)

    # (4) Unflatten + column bicubic in one MXU matmul:
    #     T[h, p] = sum_j y[j] * Mrow[h, j] * QR[j, p]
    a = y * mrow_ref[...]                                        # (H, lf)
    t = jnp.dot(a, qr_ref[...], preferred_element_type=jnp.float32)   # (H, Wo)

    # (5) Row bicubic; even/odd packed when that makes the store 128-lane dense.
    if pack:
        ze = jnp.dot(l_ref[0], t, preferred_element_type=jnp.float32)  # (Ho//2, Wo)
        zo = jnp.dot(l_ref[1], t, preferred_element_type=jnp.float32)  # (Ho//2, Wo)
        o_ref[...] = jnp.concatenate([ze, zo], axis=1)           # (Ho//2, 2*Wo)
    else:
        o_ref[...] = jnp.dot(l_ref[0], t, preferred_element_type=jnp.float32)


def aux_head_layer(x_nchw, w9c, b, ho, wo):
    """One head: x (N, C, H, W) -> (N, 1, Ho, Wo)."""
    n, c, h, w = x_nchw.shape
    lf = h * w
    srcmask, mrow, qr, lmat, pack = _head_constants(h, w, ho, wo)
    if pack:
        orows, ocols = ho // 2, 2 * wo
    else:
        orows, ocols = ho, wo

    # Free reshape (NCHW is already (C, H*W)-contiguous): no transpose, no pad.
    x3 = x_nchw.reshape(n, c, lf).astype(jnp.float32)

    kernel = functools.partial(aux_head_kernel, H=h, W=w, pack=pack)
    flops = int(n * (2 * 9 * c * lf + 2 * h * lf * wo + 2 * ho * h * wo + 30 * lf))
    bytes_accessed = int(4 * (n * c * lf + n * orows * ocols + w9c.size + 1
                              + srcmask.size + mrow.size + qr.size + lmat.size))

    out = pl.pallas_call(
        kernel,
        out_shape=jax.ShapeDtypeStruct((n, orows, ocols), jnp.float32),
        grid=(n,),
        in_specs=[
            pl.BlockSpec((None, c, lf), lambda i: (i, 0, 0)),
            pl.BlockSpec((9, c), lambda i: (0, 0)),
            pl.BlockSpec(memory_space=pltpu.MemorySpace.SMEM),
            pl.BlockSpec(tuple(srcmask.shape), lambda i: (0, 0)),
            pl.BlockSpec((h, lf), lambda i: (0, 0)),
            pl.BlockSpec((lf, wo), lambda i: (0, 0)),
            pl.BlockSpec(tuple(lmat.shape), lambda i: (0, 0, 0)),
        ],
        out_specs=pl.BlockSpec((None, orows, ocols), lambda i: (i, 0, 0)),
        compiler_params=pltpu.CompilerParams(
            dimension_semantics=("parallel",),
            vmem_limit_bytes=32 * 1024 * 1024,
        ),
        cost_estimate=pl.CostEstimate(
            flops=flops, transcendentals=int(n * lf),
            bytes_accessed=bytes_accessed),
    )(x3, w9c, b, srcmask, mrow, qr, lmat)

    if pack:
        # (N, Ho//2, 2*Wo) row-major == (N, Ho, Wo) row-major: free reshape.
        out = out.reshape(n, ho, wo)
    return out[:, None, :, :]


def aux_head_forward(features_nchw, params):
    """features_nchw: list of 4 arrays (N, C_i, H_i, W_i) with C = 64/256/512/1024."""
    h0, w0 = features_nchw[0].shape[2:]
    ho, wo = 4 * h0, 4 * w0
    outs = []
    for x, (w9c, b) in zip(features_nchw, params):
        outs.append(aux_head_layer(x, w9c, b, ho, wo))
    return outs


# ----------------------------------------------------------------------------
# Deterministic parameter init (PyTorch Conv2d default: U(-1/sqrt(fan_in), ...))
# Weights stored as (9, C): row k = 3*dy + dx.
# ----------------------------------------------------------------------------
def init_aux_head_params(key):
    in_channels = (64, 256, 512, 1024)
    params = []
    for i, c in enumerate(in_channels):
        kw, kb = jax.random.split(jax.random.fold_in(key, i))
        bound = 1.0 / math.sqrt(c * 9)
        w = jax.random.uniform(kw, (9, c), jnp.float32, -bound, bound)
        b = jax.random.uniform(kb, (1,), jnp.float32, -bound, bound)
        params.append((w, b))
    return params


# ----------------------------------------------------------------------------
# Pure numpy (float64) reference for correctness checking
# ----------------------------------------------------------------------------
def reference_forward_np(features, params):
    feats = [np.asarray(f, dtype=np.float64) for f in features]
    h0, w0 = feats[0].shape[2:]
    img_h, img_w = 4 * h0, 4 * w0
    outs = []
    for x, (w9c, b) in zip(feats, params):
        wn = np.asarray(w9c, np.float64)          # (9, C)
        bn = float(np.asarray(b)[0])
        n, c, h, w = x.shape
        xp = np.pad(x, ((0, 0), (0, 0), (1, 1), (1, 1)))
        y = np.zeros((n, h, w))
        for dy in range(3):
            for dx in range(3):
                y += np.einsum('nchw,c->nhw',
                               xp[:, :, dy:dy + h, dx:dx + w], wn[3 * dy + dx])
        y = 1.0 / (1.0 + np.exp(-(y + bn)))
        L = bicubic_matrix(h, img_h).astype(np.float64)
        R = bicubic_matrix(w, img_w).astype(np.float64)
        z = np.einsum('oh,nhw,pw->nop', L, y, R)[:, None]
        outs.append(z)
    return outs


if __name__ == "__main__":
    key = jax.random.PRNGKey(0)
    params = init_aux_head_params(key)

    # Small multi-scale features consistent with the module's channel counts.
    shapes = [(2, 64, 16, 16), (2, 256, 16, 16), (2, 512, 8, 8), (2, 1024, 4, 4)]
    feats = [
        jax.random.normal(jax.random.fold_in(key, 100 + i), s, jnp.float32)
        for i, s in enumerate(shapes)
    ]

    outs = aux_head_forward(feats, params)
    outs = [jax.block_until_ready(o) for o in outs]

    refs = reference_forward_np(feats, params)
    for o, r in zip(outs, refs):
        assert o.shape == r.shape, (o.shape, r.shape)
        max_err = float(np.max(np.abs(np.asarray(o, np.float64) - r)))
        assert max_err < 2e-2, f"max abs error too large: {max_err}"

    print("KERNEL_OK")
</pallas_src>

<mosaic_0001>
module attributes {stable_mosaic.version = 11 : i64} {
  func.func @aux_head_kernel(%arg0: i32, %arg1: memref<1x64x256xf32, #tpu.memory_space<vmem>>, %arg2: memref<9x64xf32, #tpu.memory_space<vmem>>, %arg3: memref<1xf32, #tpu.memory_space<smem>>, %arg4: memref<9x290xf32, #tpu.memory_space<vmem>>, %arg5: memref<16x256xf32, #tpu.memory_space<vmem>>, %arg6: memref<256x64xf32, #tpu.memory_space<vmem>>, %arg7: memref<2x32x16xf32, #tpu.memory_space<vmem>>, %arg8: memref<1x32x128xf32, #tpu.memory_space<vmem>>) attributes {dimension_semantics = [#tpu.dimension_semantics<parallel>], iteration_bounds = array<i64: 2>, scalar_prefetch = 0 : i64, scratch_operands = 0 : i64, tpu.core_type = #tpu.core_type<tc>, window_params = [{transform_indices = @transform_0, window_bounds = array<i64: 1, 64, 256>}, {pipeline_mode = #tpu.pipeline_mode<synchronous>, transform_indices = @transform_1, window_bounds = array<i64: 9, 64>}, {transform_indices = @transform_2, window_bounds = array<i64: 1>}, {pipeline_mode = #tpu.pipeline_mode<synchronous>, transform_indices = @transform_3, window_bounds = array<i64: 9, 290>}, {pipeline_mode = #tpu.pipeline_mode<synchronous>, transform_indices = @transform_4, window_bounds = array<i64: 16, 256>}, {pipeline_mode = #tpu.pipeline_mode<synchronous>, transform_indices = @transform_5, window_bounds = array<i64: 256, 64>}, {pipeline_mode = #tpu.pipeline_mode<synchronous>, transform_indices = @transform_6, window_bounds = array<i64: 2, 32, 16>}, {transform_indices = @transform_7, window_bounds = array<i64: 1, 32, 128>}]} {
    %c0 = arith.constant 0 : index
    %c0_0 = arith.constant 0 : index
    %0 = vector.load %arg2[%c0, %c0_0] : memref<9x64xf32, #tpu.memory_space<vmem>>, vector<9x64xf32>
    %1 = arith.truncf %0 : vector<9x64xf32> to vector<9x64xbf16>
    %c0_1 = arith.constant 0 : index
    %c0_2 = arith.constant 0 : index
    %c0_3 = arith.constant 0 : index
    %2 = vector.load %arg1[%c0_1, %c0_2, %c0_3] : memref<1x64x256xf32, #tpu.memory_space<vmem>>, vector<1x64x256xf32>
    %3 = vector.shape_cast %2 : vector<1x64x256xf32> to vector<64x256xf32>
    %4 = arith.truncf %3 : vector<64x256xf32> to vector<64x256xbf16>
    %cst = arith.constant dense<0.000000e+00> : vector<9x256xf32>
    %5 = tpu.matmul %1, %4, %cst {dimension_numbers = #tpu.dot_dimension_numbers<[1], [0], [0], [1], [0, 0, 1, 1], [], []>} : vector<9x64xbf16>, vector<64x256xbf16>, vector<9x256xf32> -> vector<9x256xf32>
    %cst_4 = arith.constant 0.000000e+00 : f32
    %6 = vector.broadcast %cst_4 : f32 to vector<9x17xf32>
    %7 = tpu.concatenate %6, %5, %6 in 1 : vector<9x17xf32>, vector<9x256xf32>, vector<9x17xf32> -> vector<9x290xf32>
    %c0_5 = arith.constant 0 : index
    %c0_6 = arith.constant 0 : index
    %8 = vector.load %arg4[%c0_5, %c0_6] : memref<9x290xf32, #tpu.memory_space<vmem>>, vector<9x290xf32>
    %9 = arith.mulf %7, %8 : vector<9x290xf32>
    %10 = vector.extract_strided_slice %9 {offsets = [0, 0], sizes = [1, 256], strides = [1, 1]} : vector<9x290xf32> to vector<1x256xf32>
    %11 = vector.extract_strided_slice %9 {offsets = [1, 1], sizes = [1, 256], strides = [1, 1]} : vector<9x290xf32> to vector<1x256xf32>
    %12 = arith.addf %10, %11 : vector<1x256xf32>
    %13 = vector.extract_strided_slice %9 {offsets = [2, 2], sizes = [1, 256], strides = [1, 1]} : vector<9x290xf32> to vector<1x256xf32>
    %14 = arith.addf %12, %13 : vector<1x256xf32>
    %15 = vector.extract_strided_slice %9 {offsets = [3, 16], sizes = [1, 256], strides = [1, 1]} : vector<9x290xf32> to vector<1x256xf32>
    %16 = arith.addf %14, %15 : vector<1x256xf32>
    %17 = vector.extract_strided_slice %9 {offsets = [4, 17], sizes = [1, 256], strides = [1, 1]} : vector<9x290xf32> to vector<1x256xf32>
    %18 = arith.addf %16, %17 : vector<1x256xf32>
    %19 = vector.extract_strided_slice %9 {offsets = [5, 18], sizes = [1, 256], strides = [1, 1]} : vector<9x290xf32> to vector<1x256xf32>
    %20 = arith.addf %18, %19 : vector<1x256xf32>
    %21 = vector.extract_strided_slice %9 {offsets = [6, 32], sizes = [1, 256], strides = [1, 1]} : vector<9x290xf32> to vector<1x256xf32>
    %22 = arith.addf %20, %21 : vector<1x256xf32>
    %23 = vector.extract_strided_slice %9 {offsets = [7, 33], sizes = [1, 256], strides = [1, 1]} : vector<9x290xf32> to vector<1x256xf32>
    %24 = arith.addf %22, %23 : vector<1x256xf32>
    %25 = vector.extract_strided_slice %9 {offsets = [8, 34], sizes = [1, 256], strides = [1, 1]} : vector<9x290xf32> to vector<1x256xf32>
    %26 = arith.addf %24, %25 : vector<1x256xf32>
    %c0_7 = arith.constant 0 : index
    %27 = memref.load %arg3[%c0_7] : memref<1xf32, #tpu.memory_space<smem>>
    %28 = vector.broadcast %27 : f32 to vector<1x256xf32>
    %29 = arith.addf %26, %28 : vector<1x256xf32>
    %30 = arith.negf %29 : vector<1x256xf32>
    %31 = math.exp %30 : vector<1x256xf32>
    %cst_8 = arith.constant 1.000000e+00 : f32
    %32 = vector.broadcast %cst_8 : f32 to vector<1x256xf32>
    %33 = arith.addf %32, %31 : vector<1x256xf32>
    %34 = arith.divf %32, %33 : vector<1x256xf32>
    %c0_9 = arith.constant 0 : index
    %c0_10 = arith.constant 0 : index
    %35 = vector.load %arg5[%c0_9, %c0_10] : memref<16x256xf32, #tpu.memory_space<vmem>>, vector<16x256xf32>
    %36 = vector.broadcast %34 : vector<1x256xf32> to vector<16x256xf32>
    %37 = arith.mulf %36, %35 : vector<16x256xf32>
    %c0_11 = arith.constant 0 : index
    %c0_12 = arith.constant 0 : index
    %38 = vector.load %arg6[%c0_11, %c0_12] : memref<256x64xf32, #tpu.memory_space<vmem>>, vector<256x64xf32>
    %cst_13 = arith.constant dense<0.000000e+00> : vector<16x64xf32>
    %39 = tpu.matmul %37, %38, %cst_13 {dimension_numbers = #tpu.dot_dimension_numbers<[1], [0], [0], [1], [0, 0, 1, 1], [], []>} : vector<16x256xf32>, vector<256x64xf32>, vector<16x64xf32> -> vector<16x64xf32>
    %c0_14 = arith.constant 0 : index
    %c0_15 = arith.constant 0 : index
    %c0_16 = arith.constant 0 : index
    %40 = vector.load %arg7[%c0_14, %c0_15, %c0_16] : memref<2x32x16xf32, #tpu.memory_space<vmem>>, vector<1x32x16xf32>
    %41 = vector.shape_cast %40 : vector<1x32x16xf32> to vector<32x16xf32>
    %cst_17 = arith.constant dense<0.000000e+00> : vector<32x64xf32>
    %42 = tpu.matmul %41, %39, %cst_17 {dimension_numbers = #tpu.dot_dimension_numbers<[1], [0], [0], [1], [0, 0, 1, 1], [], []>} : vector<32x16xf32>, vector<16x64xf32>, vector<32x64xf32> -> vector<32x64xf32>
    %c1 = arith.constant 1 : index
    %c0_18 = arith.constant 0 : index
    %c0_19 = arith.constant 0 : index
    %43 = vector.load %arg7[%c1, %c0_18, %c0_19] : memref<2x32x16xf32, #tpu.memory_space<vmem>>, vector<1x32x16xf32>
    %44 = vector.shape_cast %43 : vector<1x32x16xf32> to vector<32x16xf32>
    %cst_20 = arith.constant dense<0.000000e+00> : vector<32x64xf32>
    %45 = tpu.matmul %44, %39, %cst_20 {dimension_numbers = #tpu.dot_dimension_numbers<[1], [0], [0], [1], [0, 0, 1, 1], [], []>} : vector<32x16xf32>, vector<16x64xf32>, vector<32x64xf32> -> vector<32x64xf32>
    %46 = tpu.concatenate %42, %45 in 1 : vector<32x64xf32>, vector<32x64xf32> -> vector<32x128xf32>
    %c0_21 = arith.constant 0 : index
    %c0_22 = arith.constant 0 : index
    %c0_23 = arith.constant 0 : index
    %47 = vector.load %arg8[%c0_21, %c0_22, %c0_23] : memref<1x32x128xf32, #tpu.memory_space<vmem>>, vector<1x32x128xf32>
    %48 = vector.shape_cast %47 : vector<1x32x128xf32> to vector<32x128xf32>
    %49 = vector.shape_cast %46 : vector<32x128xf32> to vector<1x32x128xf32>
    tpu.vector_store %arg8[%c0_21, %c0_22, %c0_23], %49 {strides = array<i32>} : memref<1x32x128xf32, #tpu.memory_space<vmem>>, vector<1x32x128xf32>,
    return
  }
  func.func @transform_0(%arg0: i32) -> (i32, i32, i32) {
    %c0_i32 = arith.constant 0 : i32
    %c0_i32_0 = arith.constant 0 : i32
    %c0_i32_1 = arith.constant 0 : i32
    return %arg0, %c0_i32, %c0_i32_0 : i32, i32, i32
  }
  func.func @transform_1(%arg0: i32) -> (i32, i32) {
    %c0_i32 = arith.constant 0 : i32
    %c0_i32_0 = arith.constant 0 : i32
    %c0_i32_1 = arith.constant 0 : i32
    return %c0_i32, %c0_i32_0 : i32, i32
  }
  func.func @transform_2(%arg0: i32) -> i32 {
    %c0_i32 = arith.constant 0 : i32
    %c0_i32_0 = arith.constant 0 : i32
    return %c0_i32 : i32
  }
  func.func @transform_3(%arg0: i32) -> (i32, i32) {
    %c0_i32 = arith.constant 0 : i32
    %c0_i32_0 = arith.constant 0 : i32
    %c0_i32_1 = arith.constant 0 : i32
    return %c0_i32, %c0_i32_0 : i32, i32
  }
  func.func @transform_4(%arg0: i32) -> (i32, i32) {
    %c0_i32 = arith.constant 0 : i32
    %c0_i32_0 = arith.constant 0 : i32
    %c0_i32_1 = arith.constant 0 : i32
    return %c0_i32, %c0_i32_0 : i32, i32
  }
  func.func @transform_5(%arg0: i32) -> (i32, i32) {
    %c0_i32 = arith.constant 0 : i32
    %c0_i32_0 = arith.constant 0 : i32
    %c0_i32_1 = arith.constant 0 : i32
    return %c0_i32, %c0_i32_0 : i32, i32
  }
  func.func @transform_6(%arg0: i32) -> (i32, i32, i32) {
    %c0_i32 = arith.constant 0 : i32
    %c0_i32_0 = arith.constant 0 : i32
    %c0_i32_1 = arith.constant 0 : i32
    %c0_i32_2 = arith.constant 0 : i32
    return %c0_i32, %c0_i32_0, %c0_i32_1 : i32, i32, i32
  }
  func.func @transform_7(%arg0: i32) -> (i32, i32, i32) {
    %c0_i32 = arith.constant 0 : i32
    %c0_i32_0 = arith.constant 0 : i32
    %c0_i32_1 = arith.constant 0 : i32
    return %arg0, %c0_i32, %c0_i32_0 : i32, i32, i32
  }
}

</mosaic_0001>

<bundles_post_ra>
// kernel: tpu_custom_call.1
= control target key start
LH: loop header
LB: loop body
LE: loop exit
PB: predicated region body
PF: predicated region fallthrough
CT: control target
= control target key end

     0   :  { %s1594_s0 = inlined_call_operand.vmem [shape: f32[2,64,256], index: 0, kind: input, shape index: {}]   ;;  %s1595_s1 = inlined_call_operand.vmem [shape: f32[9,64], index: 1, kind: input, shape index: {}]   ;;  %s1596_s2 = inlined_call_operand.<no memory space> [shape: f32[1], index: 2, kind: input, shape index: {}]   ;;  %s1597_s3 = inlined_call_operand.vmem [shape: f32[9,290], index: 3, kind: input, shape index: {}]   ;;  %s1598_s4 = inlined_call_operand.vmem [shape: f32[16,256], index: 4, kind: input, shape index: {}]   ;;  %s1599_s5 = inlined_call_operand.vmem [shape: f32[256,64], index: 5, kind: input, shape index: {}]   ;;  %s1600_s6 = inlined_call_operand.vmem [shape: f32[2,32,16], index: 6, kind: input, shape index: {}]   ;;  %s1601_s7 = inlined_call_operand.hbm [shape: f32[2,32,128], index: 7, kind: output, shape index: {}]  }
   0x1   :  { %12 = sst [smem:[#allocation2]] %s1596_s2 }
   0x2   :  { %13 = vsyncpa [#allocation4], 0 }
   0x3   :  { %15 = vsyncpa [#allocation4 + $0x1], 0  ;;  %s1284_s26 = smov 0   ;;  %s1286_s27 = smov 0  }
   0x4   :  { %s1288_s28 = smov 0   ;;  %s1290_s29 = smov 0  }
   0x5 LB: > { %s1305_s2 = sadd.s32 4294967295, %s1225_s29   ;;  %s964_s30 = sadd.s32 4294967294, %s1225_s29   ;;  %s1225_s29 = sphi %s1290_s29, %s1607_s29   ;;  %s1221_s28 = sphi %s1288_s28, %s1606_s28   ;;  %s1217_s27 = sphi %s1286_s27, %s1605_s27   ;;  %s1213_s26 = sphi %s1284_s26, %s1604_s26  }
   0x6   : > { %s1309_s8 = sadd.s32 1, %s1225_s29   ;;  %s180_s9 = sadd.s32 1, %s1221_s28 }
   0x7   : > { %s177_s10 = ssub.s32 %s1225_s29, %s1309_s8  ;;  %p190_p0 = scmp.ne.s32.totalorder %s1221_s28, %s1217_s27 }
   0x8   : > { %p178_p1 = scmp.eq.s32.totalorder %s177_s10, 0  ;;  %p191_p2 = scmp.eq.s32.totalorder %s1305_s2, 1 }
   0x9   : > { %p196_p3 = scmp.ne.s32.totalorder %s1217_s27, %s1213_s26  ;;  %p197_p4 = scmp.eq.s32.totalorder %s964_s30, 1 }
   0xa   : > { %s1320_s11 = scalar_select %p178_p1, %s1221_s28, %s180_s9  }
   0xb   : > { %p1322_p5 = por %p191_p2, %p190_p0  ;;  %p1326_p6 = por %p197_p4, %p196_p3 }
   0xc   : > { %p967_p7 = scmp.ge.s32.totalorder %s1225_s29, 1  ;;  %p241_p8 = scmp.lt.s32.totalorder %s1225_s29, 3 }
   0xe   : > { %p242_p9 = pnand %p967_p7, %p241_p8 }
   0xf   : > { %p273_p10 = scmp.lt.s32.totalorder (!%p242_p9), %s1305_s2, 1  ;;  %v1227_v0 = vmov (!%p242_p9), 0   ;;  %v279_v25 = vld [vmem:[%s1595_s1] sm:$0xff] (!%p242_p9)  ;;  %v280_v26 = vld [vmem:[%s1595_s1 + $0x8] sm:$0x1] (!%p242_p9)  ;;  %vm306_vm0 = vcmask (!%p242_p9), 523264  }
  0x10   : > { %245 = sbr.rel (%p242_p9) target bundleno = 1154 (0x482), region = 48  ;;  %342 = vmatprep.mubr.bf16.mxu0 (!%p242_p9), %v1227_v0  ;;  %v281_v27 = vpack.c.bf16 (!%p242_p9), %v280_v26, %v279_v25  ;;  %s1228_s23 = smov (!%p242_p9), 17   ;;  %vm365_vm1 = vcmask (!%p242_p9), 138240   ;;  %v378_v32 = vld [vmem:[%s1597_s3] sm:$0xff] (!%p242_p9)  ;;  %v380_v41 = vld [vmem:[%s1597_s3 + $0x10] sm:$0xff] (!%p242_p9)  ;;  %v379_v46 = vld [vmem:[%s1597_s3 + $0x8] sm:$0xff] (!%p242_p9) }
  0x11   : > { %s1229_s30 = smov (!%p242_p9), 127   ;;  %s1230_s9 = smov (!%p242_p9), 126   ;;  %v557_v26 = vld [vmem:[%s1599_s5 + $0x20] sm:$0xff] (!%p242_p9)  ;;  %vm402_vm2 = vcmask (!%p242_p9), 1039360   ;;  %vm418_vm3 = vcmask (!%p242_p9), 1031168   ;;  %vm434_vm4 = vcmask (!%p242_p9), 916480  }
  0x12   : > { %s1232_s16 = smov (!%p242_p9), 111   ;;  %s1233_s19 = smov (!%p242_p9), 110   ;;  %vm450_vm5 = vcmask (!%p242_p9), 908288   ;;  %vm466_vm6 = vcmask (!%p242_p9), 900096   ;;  %vm482_vm7 = vcmask (!%p242_p9), 785408   ;;  %vm498_vm8 = vcmask (!%p242_p9), 777216  }
  0x13   : > { %s1234_s20 = smov (!%p242_p9), 96   ;;  %s1235_s21 = smov (!%p242_p9), 95   ;;  %vm514_vm9 = vcmask (!%p242_p9), 769024   ;;  %vm664_vm10 = vcmask (!%p242_p9), 130048  }
  0x14   : > { %s1238_s24 = smov (!%p242_p9), [#allocation3]  }
  0x15   : > { %s1167_s25 = sshll.u32 (!%p242_p9), %s1238_s24, 4  ;;  %s1168_s25 = int_to_ptr.vmem [resolvable:$false] %s1167_s25 }
  0x17   : > { %s274_s14 = scalar_select %p273_p10, %s1305_s2, 1 }
  0x19   : > { %s991_s15 = sshll.u32 %s274_s14, 7  ;;  %s1237_s14 = smov 64  }
  0x1a   : > { %s277_s18 = scalar_lea.vmem %s1594_s0, %s991_s15  ;;  %s1231_s15 = smov 112  }
  0x1b   : > { %v283_v1 = vld [vmem:[%s277_s18 + $0x8] sm:$0xff]  ;;  %v285_v2 = vld [vmem:[%s277_s18 + $0x18] sm:$0xff]  ;;  %v282_v3 = vld [vmem:[%s277_s18] sm:$0xff] }
  0x1c   : > { %v299_v4 = vpack.c.bf16 %v285_v2, %v283_v1  ;;  %v284_v5 = vld [vmem:[%s277_s18 + $0x10] sm:$0xff]  ;;  %v287_v6 = vld [vmem:[%s277_s18 + $0x28] sm:$0xff]  ;;  %v289_v7 = vld [vmem:[%s277_s18 + $0x38] sm:$0xff] }
  0x1d   : > { %v298_v8 = vpack.c.bf16 %v284_v5, %v282_v3  ;;  %v301_v9 = vpack.c.bf16 %v289_v7, %v287_v6  ;;  %v286_v10 = vld [vmem:[%s277_s18 + $0x20] sm:$0xff]  ;;  %v288_v11 = vld [vmem:[%s277_s18 + $0x30] sm:$0xff]  ;;  %v291_v12 = vld [vmem:[%s277_s18 + $0x48] sm:$0xff] }
  0x1e   : > { %310 = vmatprep.subr.bf16.mxu0 %v299_v4  ;;  %v293_v13 = vld [vmem:[%s277_s18 + $0x58] sm:$0xff]  ;;  %v300_v14 = vpack.c.bf16 %v288_v11, %v286_v10  ;;  %v290_v16 = vld [vmem:[%s277_s18 + $0x40] sm:$0xff]  ;;  %v292_v17 = vld [vmem:[%s277_s18 + $0x50] sm:$0xff] }
  0x1f   : > { %311 = vmatpush1.bf16.msra.mxu0 %v298_v8  ;;  %v303_v15 = vpack.c.bf16 %v293_v13, %v291_v12  ;;  %v295_v18 = vld [vmem:[%s277_s18 + $0x68] sm:$0xff]  ;;  %v297_v19 = vld [vmem:[%s277_s18 + $0x78] sm:$0xff]  ;;  %v302_v20 = vpack.c.bf16 %v292_v17, %v290_v16  ;;  %v294_v22 = vld [vmem:[%s277_s18 + $0x60] sm:$0xff] }
  0x20   : > { %312 = vmatprep.subr.bf16.mxu0 %v301_v9  ;;  %v305_v21 = vpack.c.bf16 %v297_v19, %v295_v18  ;;  %v296_v23 = vld [vmem:[%s277_s18 + $0x70] sm:$0xff]  ;;  %v382_v1 = vld [vmem:[%s1597_s3 + $0x20] sm:$0x1]  ;;  %v570_v4 = vld [vmem:[%s1599_s5 + $0x88] sm:$0xff]  ;;  %s521_s18 = sld [smem:[#allocation2]] }
  0x21   : > { %v304_v24 = vpack.c.bf16 %v296_v23, %v294_v22  ;;  %v569_v3 = vld [vmem:[%s1599_s5 + $0x80] sm:$0xff]  ;;  %v554_v7 = vld [vmem:[%s1599_s5 + $0x8] sm:$0xff]  ;;  %v381_v9 = vld [vmem:[%s1597_s3 + $0x18] sm:$0x1] }
  0x22   : > { %v1063_v5 = vpack.c.bf16 %v570_v4, %v569_v3  ;;  %v553_v6 = vld [vmem:[%s1599_s5] sm:$0xff]  ;;  %v383_v13 = vld [vmem:[%s1597_s3 + $0x28] sm:$0x1]  ;;  %v572_v16 = vld [vmem:[%s1599_s5 + $0x98] sm:$0xff] }
  0x23   : > { %313 = vmatpush1.bf16.msra.mxu0 %v300_v14  ;;  %v1065_v8 = vpack.c.bf16 %v554_v7, %v553_v6  ;;  %v555_v18 = vld [vmem:[%s1599_s5 + $0x10] sm:$0xff]  ;;  %v556_v19 = vld [vmem:[%s1599_s5 + $0x18] sm:$0xff]  ;;  %v573_v23 = vld [vmem:[%s1599_s5 + $0xa0] sm:$0xff] }
  0x24   : > { %314 = vmatprep.subr.bf16.mxu0 %v303_v15  ;;  %1064 = vmatprep.subr.bf16.mxu1 %v1063_v5  ;;  %v571_v15 = vld [vmem:[%s1599_s5 + $0x90] sm:$0xff] }
  0x25   : > { %1066 = vmatpush3.bf16.msra.mxu1 %v1065_v8  ;;  %v1067_v17 = vpack.c.bf16 %v572_v16, %v571_v15 }
  0x27   : > { %315 = vmatpush1.bf16.msra.mxu0 %v302_v20  ;;  %v1069_v20 = vpack.c.bf16 %v556_v19, %v555_v18  ;;  %1068 = vmatprep.subr.bf16.mxu1 %v1067_v17 }
  0x28   : > { %316 = vmatprep.subr.bf16.mxu0 %v305_v21 }
  0x29   : > { %1070 = vmatpush3.bf16.msra.mxu1 %v1069_v20 }
  0x2b   : > { %317 = vmatpush1.bf16.msra.mxu0 %v304_v24  ;;  %v574_v24 = vld [vmem:[%s1599_s5 + $0xa8] sm:$0xff] }
  0x2c   : > { %v1071_v25 = vpack.c.bf16 %v574_v24, %v573_v23 }
  0x2e   : > { %971 = vmatmul.mubr.msk.bf16.vlgmr.msra.gmra.mrb[0].mxu0 %vm306_vm0, %v281_v27  ;;  %v558_v27 = vld [vmem:[%s1599_s5 + $0x28] sm:$0xff]  ;;  %1072 = vmatprep.subr.bf16.mxu1 %v1071_v25 }
 0x101   : > { %v344_v28 = vpop.f32.mrb[0].mxu0 }
 0x102   : > { %357 = vrot.lane.b32.xlu0 %v344_v28, %s1228_s23  ;;  %v346_v29 = vpop.f32.mrb[1].mxu0  ;;  %v1073_v28 = vpack.c.bf16 %v558_v27, %v557_v26 }
 0x103   : > { %v348_v30 = vpop.f32.mrb[2].mxu0 }
 0x104   : > { %361 = vrot.lane.b32.xlu1 %v348_v30, %s1228_s23  ;;  %v350_v31 = vpop.f32.mrb[3].mxu0  ;;  %1074 = vmatpush3.bf16.msra.mxu1 %v1073_v28  ;;  %v576_v30 = vld [vmem:[%s1599_s5 + $0xb8] sm:$0xff] }
 0x106   : > { %359 = vrot.lane.b32.xlu0 %v346_v29, %s1228_s23  ;;  %v575_v29 = vld [vmem:[%s1599_s5 + $0xb0] sm:$0xff] }
 0x108   : > { %363 = vrot.lane.b32.xlu1 %v350_v31, %s1228_s23  ;;  %v1075_v31 = vpack.c.bf16 %v576_v30, %v575_v29 }
 0x10a   : > { %1076 = vmatprep.subr.bf16.mxu1 %v1075_v31 }
 0x174   : > { %v358_v33 = vpop.permute.xlu0 %357 }
 0x175   : > { %v374_v34 = vsel %vm365_vm1, 0.0, %v358_v33 }
 0x176   : > { %v1348_v35 = vmul.f32 %v378_v32, %v374_v34  ;;  %v362_v57 = vpop.permute.xlu1 %361  ;;  %v559_v32 = vld [vmem:[%s1599_s5 + $0x30] sm:$0xff] }
 0x177   : > { %v375_v12 = vsel %vm365_vm1, 0.0, %v362_v57 }
 0x178   : > { %v393_v36 = vrot.slane %v1348_v35, 1  ;;  %v409_v37 = vrot.slane %v1348_v35, 2  ;;  %v360_v38 = vpop.permute.xlu0 %359  ;;  %v425_v39 = vrot.slane %v1348_v35, 3  ;;  %v441_v40 = vrot.slane %v1348_v35, 4 }
 0x179   : > { %v376_v42 = vsel %vm365_vm1, %v360_v38, 0.0  ;;  %v457_v44 = vrot.slane %v1348_v35, 5  ;;  %v473_v45 = vrot.slane %v1348_v35, 6  ;;  %v366_v47 = vsel %vm365_vm1, %v358_v33, %v360_v38  ;;  %v560_v33 = vld [vmem:[%s1599_s5 + $0x38] sm:$0xff] }
 0x17a   : > { %396 = vrot.lane.b32.xlu0 %v393_v36, %s1229_s30  ;;  %412 = vrot.lane.b32.xlu1 %v409_v37, %s1230_s9  ;;  %v386_v43 = vmul.f32 %v380_v41, %v376_v42  ;;  %v1367_v48 = vmul.f32 %v379_v46, %v366_v47  ;;  %v489_v49 = vrot.slane %v1348_v35, 7  ;;  %v364_v62 = vpop.permute.xlu1 %363  ;;  %v387_v21 = vmul.f32 %v381_v9, %v375_v12  ;;  %v577_v36 = vld [vmem:[%s1599_s5 + $0xc0] sm:$0xff]  ;;  %v578_v37 = vld [vmem:[%s1599_s5 + $0xc8] sm:$0xff] }
 0x17b   : > { %v367_v2 = vsel %vm365_vm1, %v362_v57, %v364_v62  ;;  %v377_v14 = vsel %vm365_vm1, %v364_v62, 0.0  ;;  %v1077_v34 = vpack.c.bf16 %v560_v33, %v559_v32  ;;  %v1079_v38 = vpack.c.bf16 %v578_v37, %v577_v36  ;;  %v579_v41 = vld [vmem:[%s1599_s5 + $0xd0] sm:$0xff]  ;;  %v581_v47 = vld [vmem:[%s1599_s5 + $0xe0] sm:$0xff] }
 0x17c   : > { %v395_v50 = vrot.slane %v386_v43, 1  ;;  %v394_v51 = vrot.slane %v1367_v48, 1  ;;  %v410_v52 = vrot.slane %v1367_v48, 2  ;;  %v411_v53 = vrot.slane %v386_v43, 2 }
 0x17d   : > { %v427_v54 = vrot.slane %v386_v43, 3  ;;  %v426_v55 = vrot.slane %v1367_v48, 3  ;;  %v442_v56 = vrot.slane %v1367_v48, 4  ;;  %v443_v58 = vrot.slane %v386_v43, 4  ;;  %1078 = vmatpush3.bf16.msra.mxu1 %v1077_v34 }
 0x17e   : > { %428 = vrot.lane.b32.xlu0 %v425_v39, %s1231_s15  ;;  %444 = vrot.lane.b32.xlu1 %v441_v40, %s1232_s16  ;;  %v459_v59 = vrot.slane %v386_v43, 5  ;;  %v458_v60 = vrot.slane %v1367_v48, 5  ;;  %v474_v61 = vrot.slane %v1367_v48, 6  ;;  %v475_v63 = vrot.slane %v386_v43, 6  ;;  %v561_v39 = vld [vmem:[%s1599_s5 + $0x40] sm:$0xff]  ;;  %v562_v40 = vld [vmem:[%s1599_s5 + $0x48] sm:$0xff] }
 0x17f   : > { %v491_v0 = vrot.slane %v386_v43, 7  ;;  %v388_v10 = vmul.f32 %v382_v1, %v367_v2  ;;  %v490_v11 = vrot.slane %v1367_v48, 7  ;;  %v389_v22 = vmul.f32 %v383_v13, %v377_v14  ;;  %v580_v43 = vld [vmem:[%s1599_s5 + $0xd8] sm:$0xff]  ;;  %1080 = vmatprep.subr.bf16.mxu1 %v1079_v38 }
 0x180   : > { %v1081_v42 = vpack.c.bf16 %v562_v40, %v561_v39  ;;  %v1083_v46 = vpack.c.bf16 %v580_v43, %v579_v41 }
 0x182   : > { %460 = vrot.lane.b32.xlu0 %v457_v44, %s1233_s19  ;;  %476 = vrot.lane.b32.xlu1 %v473_v45, %s1234_s20  ;;  %v563_v44 = vld [vmem:[%s1599_s5 + $0x50] sm:$0xff]  ;;  %v564_v45 = vld [vmem:[%s1599_s5 + $0x58] sm:$0xff] }
 0x183   : > { %1082 = vmatpush3.bf16.msra.mxu1 %v1081_v42 }
 0x184   : > { %1084 = vmatprep.subr.bf16.mxu1 %v1083_v46 }
 0x186   : > { %492 = vrot.lane.b32.xlu0 %v489_v49, %s1235_s21  ;;  %400 = vrot.lane.b32.xlu1 %v395_v50, %s1229_s30  ;;  %v582_v49 = vld [vmem:[%s1599_s5 + $0xe8] sm:$0xff]  ;;  %v1085_v50 = vpack.c.bf16 %v564_v45, %v563_v44 }
 0x188   : > { %1086 = vmatpush3.bf16.msra.mxu1 %v1085_v50 }
 0x18a   : > { %398 = vrot.lane.b32.xlu0 %v394_v51, %s1229_s30  ;;  %414 = vrot.lane.b32.xlu1 %v410_v52, %s1230_s9  ;;  %s1236_s30 = smov 94   ;;  %v1087_v51 = vpack.c.bf16 %v582_v49, %v581_v47  ;;  %v565_v52 = vld [vmem:[%s1599_s5 + $0x60] sm:$0xff]  ;;  %v522_v49 = vstv %s521_s18  ;;  %s992_s18 = sshll.u32 %s1305_s2, 9 }
 0x18b   : > { %s1550_s22 = scalar_lea.hbm %s1601_s7, %s992_s18 }
 0x18c   : > { %1088 = vmatprep.subr.bf16.mxu1 %v1087_v51 }
 0x18e   : > { %416 = vrot.lane.b32.xlu0 %v411_v53, %s1230_s9  ;;  %432 = vrot.lane.b32.xlu1 %v427_v54, %s1231_s15  ;;  %v566_v53 = vld [vmem:[%s1599_s5 + $0x68] sm:$0xff]  ;;  %v583_v54 = vld [vmem:[%s1599_s5 + $0xf0] sm:$0xff]  ;;  %s1169_s9 = scalar_lea.vmem %s1168_s25, 1024 }
 0x192   : > { %430 = vrot.lane.b32.xlu0 %v426_v55, %s1231_s15  ;;  %446 = vrot.lane.b32.xlu1 %v442_v56, %s1232_s16  ;;  %v584_v55 = vld [vmem:[%s1599_s5 + $0xf8] sm:$0xff]  ;;  %v1089_v56 = vpack.c.bf16 %v566_v53, %v565_v52  ;;  %s270_s15 = sand.u32 1, %s1217_s27  }
 0x193   : > { %v1091_v57 = vpack.c.bf16 %v584_v55, %v583_v54  ;;  %s1553_s2 = scalar_lea.sflag [#allocation4], %s270_s15 }
 0x194   : > { %1090 = vmatpush3.bf16.msra.mxu1 %v1089_v56 }
 0x195   : > { %1092 = vmatprep.subr.bf16.mxu1 %v1091_v57 }
 0x196   : > { %448 = vrot.lane.b32.xlu0 %v443_v58, %s1232_s16  ;;  %464 = vrot.lane.b32.xlu1 %v459_v59, %s1233_s19  ;;  %v567_v58 = vld [vmem:[%s1599_s5 + $0x70] sm:$0xff]  ;;  %v568_v59 = vld [vmem:[%s1599_s5 + $0x78] sm:$0xff]  ;;  %s968_s16 = sshll.u32 %s270_s15, 5 }
 0x197   : > { %s272_s17 = scalar_lea.vmem [#allocation3], %s968_s16 }
 0x19a   : > { %462 = vrot.lane.b32.xlu0 %v458_v60, %s1233_s19  ;;  %478 = vrot.lane.b32.xlu1 %v474_v61, %s1234_s20  ;;  %v1093_v60 = vpack.c.bf16 %v568_v59, %v567_v58 }
 0x19c   : > { %1094 = vmatpush3.bf16.msra.mxu1 %v1093_v60 }
 0x19e   : > { %480 = vrot.lane.b32.xlu0 %v475_v63, %s1234_s20  ;;  %496 = vrot.lane.b32.xlu1 %v491_v0, %s1235_s21 }
 0x1a2   : > { %494 = vrot.lane.b32.xlu0 %v490_v11, %s1235_s21  ;;  %510 = vrot.lane.b32.xlu1 %v388_v10, %s1236_s30  ;;  %s902_s21 = sshll.u32 %s272_s17, 4  ;;  %s1544_s21 = int_to_ptr.vmem [resolvable:$true] %s902_s21 }
 0x1a3   : > { %s1163_s23 = scalar_lea.vmem %s1544_s21, 512  ;;  %p1170_p0 = scmp.lt.s32.totalorder %s1544_s21, %s1168_s25 }
 0x1a4   : > { %p1164_p11 = scmp.ne.s32.totalorder %s1544_s21, %s1163_s23  ;;  %p1171_p1 = scmp.lt.s32.totalorder %s1169_s9, %s1163_s23 }
 0x1a6   : > { %512 = vrot.lane.b32.xlu0 %v389_v22, %s1236_s30  ;;  %508 = vrot.lane.b32.xlu1 %v387_v21, %s1236_s30  ;;  %p1165_p12 = pnand %p1164_p11, %p1322_p5  ;;  %p1172_p2 = por %p1171_p1, %p1170_p0 }
 0x1a8   : > { %p1166_p13 = pneg %p1165_p12 }
 0x1aa   : > { %p1173_p3 = pnand %p1172_p2, %p1166_p13 }
 0x1ec   : > { %v397_v61 = vpop.permute.xlu0 %396  ;;  %v413_v62 = vpop.permute.xlu1 %412 }
 0x1f0   : > { %v429_v63 = vpop.permute.xlu0 %428  ;;  %v445_v0 = vpop.permute.xlu1 %444 }
 0x1f4   : > { %v461_v1 = vpop.permute.xlu0 %460  ;;  %v477_v2 = vpop.permute.xlu1 %476 }
 0x1f8   : > { %v493_v3 = vpop.permute.xlu0 %492  ;;  %v401_v4 = vpop.permute.xlu1 %400 }
 0x1fc   : > { %v399_v5 = vpop.permute.xlu0 %398  ;;  %v415_v6 = vpop.permute.xlu1 %414 }
 0x1fd   : > { %v403_v9 = vsel %vm402_vm2, %v397_v61, %v399_v5  ;;  %v404_v15 = vsel %vm402_vm2, %v399_v5, %v401_v4  ;;  %v419_v16 = vsel %vm418_vm3, %v413_v62, %v415_v6  ;;  %v541_v62 = vlaneseq  ;;  %v537_v5 = vld [vmem:[%s1598_s4] sm:$0xff] }
 0x1fe   : > { %v407_v12 = vadd.f32 %v403_v9, %v1348_v35  ;;  %v408_v20 = vadd.f32 %v404_v15, %v1367_v48 }
 0x200   : > { %v417_v7 = vpop.permute.xlu0 %416  ;;  %v433_v8 = vpop.permute.xlu1 %432  ;;  %v423_v18 = vadd.f32 %v419_v16, %v407_v12 }
 0x201   : > { %v420_v19 = vsel %vm418_vm3, %v415_v6, %v417_v7  ;;  %v540_v7 = vld [vmem:[%s1598_s4 + $0x18] sm:$0xff] }
 0x202   : > { %v424_v25 = vadd.f32 %v420_v19, %v408_v20 }
 0x204   : > { %v431_v10 = vpop.permute.xlu0 %430  ;;  %v447_v11 = vpop.permute.xlu1 %446 }
 0x205   : > { %v435_v17 = vsel %vm434_vm4, %v429_v63, %v431_v10  ;;  %v436_v24 = vsel %vm434_vm4, %v431_v10, %v433_v8  ;;  %v451_v26 = vsel %vm450_vm5, %v445_v0, %v447_v11  ;;  %v542_v63 = vshrl.u32 %v541_v62, 7 }
 0x206   : > { %v439_v21 = vadd.f32 %v435_v17, %v423_v18  ;;  %v440_v28 = vadd.f32 %v436_v24, %v424_v25  ;;  %v978_v24 = vld [vmem:[%s1600_s6 + $0x20] sm:$0xff]  ;;  %v979_v25 = vld [vmem:[%s1600_s6 + $0x28] sm:$0xff] }
 0x207   : > { %v543_v0 = vsub.s32 0, %v542_v63 }
 0x208   : > { %v449_v13 = vpop.permute.xlu0 %448  ;;  %v465_v14 = vpop.permute.xlu1 %464  ;;  %v455_v29 = vadd.f32 %v451_v26, %v439_v21  ;;  %v661_v21 = vld [vmem:[%s1600_s6 + $0x8] sm:$0xff]  ;;  %v980_v26 = vld [vmem:[%s1600_s6 + $0x30] sm:$0xff] }
 0x209   : > { %v452_v35 = vsel %vm450_vm5, %v447_v11, %v449_v13  ;;  %v539_v11 = vld [vmem:[%s1598_s4 + $0x10] sm:$0xff]  ;;  %v660_v13 = vld [vmem:[%s1600_s6] sm:$0xff] }
 0x20a   : > { %v456_v33 = vadd.f32 %v452_v35, %v440_v28  ;;  %1047 = vmatprep.mubr.msk.f32.mxu0 %vm664_vm10, %v660_v13  ;;  %v981_v35 = vld [vmem:[%s1600_s6 + $0x38] sm:$0xff] }
 0x20c   : > { %v463_v22 = vpop.permute.xlu0 %462  ;;  %v479_v23 = vpop.permute.xlu1 %478 }
 0x20d   : > { %v467_v27 = vsel %vm466_vm6, %v461_v1, %v463_v22  ;;  %v468_v32 = vsel %vm466_vm6, %v463_v22, %v465_v14  ;;  %v483_v39 = vsel %vm482_vm7, %v477_v2, %v479_v23  ;;  %v538_v2 = vld [vmem:[%s1598_s4 + $0x8] sm:$0xff]  ;;  %v662_v22 = vld [vmem:[%s1600_s6 + $0x10] sm:$0xff] }
 0x20e   : > { %v471_v34 = vadd.f32 %v467_v27, %v455_v29  ;;  %v472_v36 = vadd.f32 %v468_v32, %v456_v33 }
 0x210   : > { %v481_v30 = vpop.permute.xlu0 %480  ;;  %v497_v31 = vpop.permute.xlu1 %496  ;;  %v487_v42 = vadd.f32 %v483_v39, %v471_v34 }
 0x211   : > { %v484_v48 = vsel %vm482_vm7, %v479_v23, %v481_v30  ;;  %v663_v23 = vld [vmem:[%s1600_s6 + $0x18] sm:$0xff] }
 0x212   : > { %v488_v43 = vadd.f32 %v484_v48, %v472_v36 }
 0x214   : > { %v495_v37 = vpop.permute.xlu0 %494  ;;  %v511_v38 = vpop.permute.xlu1 %510 }
 0x215   : > { %v499_v40 = vsel %vm498_vm8, %v493_v3, %v495_v37  ;;  %v500_v41 = vsel %vm498_vm8, %v495_v37, %v497_v31 }
 0x216   : > { %v503_v44 = vadd.f32 %v499_v40, %v487_v42  ;;  %v504_v45 = vadd.f32 %v500_v41, %v488_v43 }
 0x218   : > { %v513_v46 = vpop.permute.xlu0 %512  ;;  %v509_v47 = vpop.permute.xlu1 %508 }
 0x219   : > { %v516_v50 = vsel %vm514_vm9, %v511_v38, %v513_v46  ;;  %v515_v51 = vsel %vm514_vm9, %v509_v47, %v511_v38 }
 0x21a   : > { %v520_v52 = vadd.f32 %v516_v50, %v504_v45  ;;  %v519_v53 = vadd.f32 %v515_v51, %v503_v44 }
 0x21c   : > { %v524_v54 = vadd.f32 %v522_v49, %v520_v52  ;;  %v523_v55 = vadd.f32 %v522_v49, %v519_v53 }
 0x21e   : > { %v973_v56 = vmul.f32 -1.442695, %v524_v54  ;;  %v972_v57 = vmul.f32 -1.442695, %v523_v55 }
 0x220   : > { %1155 = vpow2.f32 %v973_v56 }
 0x221   : > { %1157 = vpow2.f32 %v972_v57 }
 0x22a   : > { %v1156_v58 = vpop.eup %1155 }
 0x22b   : > { %v1158_v59 = vpop.eup %1157  ;;  %v532_v60 = vadd.f32 1.0, %v1156_v58 }
 0x22c   : > { %v531_v61 = vadd.f32 1.0, %v1158_v59 }
 0x22d   : > { %1159 = vrcp.f32 %v532_v60 }
 0x22e   : > { %1161 = vrcp.f32 %v531_v61 }
 0x237   : > { %v1160_v1 = vpop.eup %1159 }
 0x238   : > { %v1162_v3 = vpop.eup %1161  ;;  %v548_v4 = vrot.slane %v1160_v1, %v543_v0 }
 0x239   : > { %v544_v6 = vrot.slane %v1162_v3, %v543_v0 }
 0x23a   : > { %v550_v8 = vmul.f32 %v548_v4, %v538_v2  ;;  %v552_v10 = vmul.f32 %v548_v4, %v540_v7 }
 0x23b   : > { %v549_v9 = vmul.f32 %v544_v6, %v537_v5  ;;  %v551_v12 = vmul.f32 %v544_v6, %v539_v11 }
 0x23c   : > { %649 = vmatprep.mubr.f32.mxu1 %v550_v8 }
 0x23d   : > { %650 = vmatmul.mubr.f32.vlgmr.msra.gmra.mrb[0].mxu1 %v549_v9 }
 0x23e   : > { %654 = vmatprep.mubr.f32.mxu1 %v552_v10 }
 0x241   : > { %655 = vmatmul.mubr.f32.gmra.mrb[2].mxu1 %v551_v12 }
 0x310   : > { %v1025_v14 = vpop.f32.mrb[0].mxu1 }
 0x311   : > { %v1026_v15 = vpop.f32.mrb[1].mxu1 }
 0x312   : > { %v1027_v16 = vadd.f32 %v1026_v15, %v1025_v14 }
 0x314   : > { %v1028_v17 = vpop.f32.mrb[2].mxu1 }
 0x315   : > { %v1029_v18 = vpop.f32.mrb[3].mxu1 }
 0x316   : > { %v1030_v19 = vadd.f32 %v1029_v18, %v1028_v17 }
 0x318   : > { %v1095_v20 = vpack.c.bf16 %v1030_v19, %v1027_v16 }
 0x31a   : > { %1096 = vmatprep.subr.bf16.mxu0 %v1095_v20 }
 0x31b   : > { %1098 = vmatpush3.bf16.msra.mxu0 %v1095_v20 }
 0x31c   : > { %1100 = vmatprep.subr.bf16.mxu0 %v1095_v20 }
 0x31e   : > { %1048 = vmatmul.mubr.msk.f32.vlgmr.msra.gmra.mrb[4].mxu0 %vm664_vm10, %v661_v21 }
 0x31f   : > { %1102 = vmatpush3.bf16.msra.mxu0 %v1095_v20  ;;  %1050 = vmatprep.mubr.msk.f32.mxu0 %vm664_vm10, %v662_v22 }
 0x322   : > { %1051 = vmatmul.mubr.msk.f32.gmra.mrb[6].mxu0 %vm664_vm10, %v663_v23 }
 0x323   : > { %1057 = vmatprep.mubr.msk.f32.mxu0 %vm664_vm10, %v978_v24 }
 0x326   : > { %1058 = vmatmul.mubr.msk.f32.vlgmr.msra.gmra.mrb[8].mxu0 %vm664_vm10, %v979_v25 }
 0x327   : > { %1060 = vmatprep.mubr.msk.f32.mxu0 %vm664_vm10, %v980_v26 }
 0x32a   : > { %1061 = vmatmul.mubr.msk.f32.gmra.mrb[10].mxu0 %vm664_vm10, %v981_v35 }
 0x3f1   : > { %v1049_v27 = vpop.f32.mrb[4].mxu0 }
 0x3f2   : > { %v743_v28 = vpop.f32.mrb[5].mxu0 }
 0x3f5   : > { %v1052_v29 = vpop.f32.mrb[6].mxu0 }
 0x3f6   : > { %v753_v30 = vpop.f32.mrb[7].mxu0 }
 0x3f9   : > { %v1059_v31 = vpop.f32.mrb[8].mxu0 }
 0x3fa   : > { %870 = vrot.lane.b32.xlu1 %v1059_v31, %s1237_s14  ;;  %v845_v32 = vpop.f32.mrb[9].mxu0 }
 0x3fb   : > { %868 = vrot.lane.b32.xlu0 %v845_v32, %s1237_s14 }
 0x3fd   : > { %v1062_v33 = vpop.f32.mrb[10].mxu0 }
 0x3fe   : > { %874 = vrot.lane.b32.xlu1 %v1062_v33, %s1237_s14  ;;  %v855_v34 = vpop.f32.mrb[11].mxu0 }
 0x3ff   : > { %872 = vrot.lane.b32.xlu0 %v855_v34, %s1237_s14 }
 0x46c   : > { %v871_v48 = vpop.permute.xlu1 %870 }
 0x46d   : > { %v881_v36 = vsel %vm306_vm0, %v1049_v27, %v871_v48  ;;  %v869_v37 = vpop.permute.xlu0 %868 }
 0x46e   : > { %885 = vst [vmem:[%s272_s17 + $0x8] sm:$0xff] %v881_v36  ;;  %v880_v38 = vsel %vm306_vm0, %v743_v28, %v869_v37 }
 0x46f   : > { %884 = vst [vmem:[%s272_s17] sm:$0xff] %v880_v38 }
 0x470   : > { %v875_v39 = vpop.permute.xlu1 %874 }
 0x471   : > { %v883_v40 = vsel %vm306_vm0, %v1052_v29, %v875_v39  ;;  %v873_v41 = vpop.permute.xlu0 %872 }
 0x472   : > { %887 = vst [vmem:[%s272_s17 + $0x18] sm:$0xff] %v883_v40  ;;  %v882_v42 = vsel %vm306_vm0, %v753_v30, %v873_v41 }
 0x473   : > { %886 = vst [vmem:[%s272_s17 + $0x10] sm:$0xff] %v882_v42 }
 0x474   : > { %1176 = shalt.err (!%p1173_p3)
}
 0x475   : > { %s1177_s10 = scalar_lea.hbm %s1550_s22, 512  ;;  %s1181_s15 = scalar_lea.hbm %s1601_s7, 1024 }
 0x476   : > { %p1178_p4 = scmp.ne.s32.totalorder %s1550_s22, %s1177_s10  ;;  %p1182_p9 = scmp.lt.u32.totalorder %s1550_s22, %s1601_s7 }
 0x477   : > { %p1183_p10 = scmp.lt.u32.totalorder %s1181_s15, %s1177_s10  ;;  %p1185_p12 = scmp.lt.u32.totalorder %s1177_s10, %s1550_s22 }
 0x478   : > { %p1179_p7 = pnand %p1178_p4, %p1322_p5 }
 0x479   : > { %p1184_p11 = por %p1183_p10, %p1182_p9 }
 0x47a   : > { %p1180_p8 = pneg %p1179_p7 }
 0x47b   : > { %p1186_p13 = por %p1185_p12, %p1184_p11 }
 0x47d   : > { %p1187_p0 = pnand %p1186_p13, %p1180_p8 }
 0x47f   : > { %1190 = shalt.err (!%p1187_p0)
}
 0x480   : > { %s1239_s18 = smov 128   ;;  %s1240_s19 = smov 8  }
 0x481   : > { %1103 = dma.vmem_to_hbm [thread:$0]  (%p1322_p5), %s1544_s21, 512, %s1550_s22, %s1553_s2, %s1239_s18, %s1239_s18, %s1240_s19  }
 0x482 PF: > { %p1109_p1 = scmp.ge.s32.totalorder %s1225_s29, 2  ;;  %s917_s20 = sand.u32 1, %s1213_s26  }
 0x483   : > { %s918_s23 = scalar_lea.sflag [#allocation4], %s917_s20 }
 0x484   : > { %p1106_p2 = pnand %p1109_p1, %p1326_p6 }
 0x486   : > { %1208 = dma.done.wait (!%p1106_p2), %s918_s23, 512  }
 0x487   : > { %1210 = vsyncadd (!%p1106_p2), %s918_s23, 4294966784  ;;  %p18_p3 = scmp.ge.s32.totalorder %s1309_s8, 4   ;;  %s1604_s26 = smov %s1217_s27 }
 0x488   : > { %s1605_s27 = smov %s1221_s28  ;;  %s1606_s28 = smov %s1320_s11 }
 0x489   : > { %s1607_s29 = smov %s1309_s8  ;;  %20 = sbr.rel (!%p18_p3) target bundleno = 5 (0x5), region = 84 }
 0x490   :  { %923 = vsyncpa [#allocation4], 1 }
 0x491   :  { %925 = vsyncpa [#allocation4 + $0x1], 1 }

</bundles_post_ra>
